<compile_context>
chip_gen: v7x
topology: tpu7x:2x2x1
jax: 0.10.0
libtpu: 0.0.40
codegen_flags: <defaults>
</compile_context>

<pallas_src>
import jax
import jax.numpy as jnp
from jax.experimental import pallas as pl
from jax.experimental.pallas import tpu as pltpu


def _fused_kernel(wT_ref, bT_ref, cwb_ref, x_ref, o_ref):
    # wT_ref : (3, 10)        VMEM, resident  — fused (w1@w2)^T
    # bT_ref : (3, 1)         VMEM, resident  — fused (b1@w2 + b2)^T
    # cwb_ref: (2,)           SMEM            — [conv_w, conv_b]
    # x_ref  : (tile_b, 10)   VMEM, streamed  — native-layout batch tile of x
    # o_ref  : (3, tile_b)    VMEM            — lane-dense output tile
    cw = cwb_ref[0]
    cb = cwb_ref[1]

    # MXU NT matmul (flash-attention-style dot_general): contract the 10-feature
    # axis of both operands.  Output lands with batch on the 128-lane axis, so the
    # store below is a dense vst (no masked 3-wide stores), and no explicit
    # transpose of x is needed anywhere (wrapper or kernel).
    s = jax.lax.dot_general(
        wT_ref[...], x_ref[...],
        dimension_numbers=(((1,), (1,)), ((), ())),
        preferred_element_type=jnp.float32)            # (3, tile_b)

    h = jnp.maximum(s + bT_ref[...], 0.0)               # fused bias + ReLU (layer2)
    o_ref[...] = h * cw + cb                             # Conv2d(1,1,1) == scale+bias


def _round_up(n, m):
    return ((n + m - 1) // m) * m


def complex_model2(x, w1, b1, w2, b2, conv_w, conv_b, *, max_tile_b=8192):
    """x: (B, 10) float32 -> (B, 1, 3, 1) float32 (NCHW, like the PyTorch module).

    Weight conventions (transposed vs. torch storage, same math):
      w1: (10, 5), b1: (1, 5) or (5,), w2: (5, 3), b2: (1, 3) or (3,),
      conv_w: scalar-sized (e.g. (1,1,1,1)), conv_b: scalar-sized (e.g. (1,)).
    """
    B = x.shape[0]
    hp = jax.lax.Precision.HIGHEST

    # Exact fusion of the two Linear layers (no nonlinearity between them):
    #   (x @ w1 + b1) @ w2 + b2 == x @ (w1 @ w2) + (b1 @ w2 + b2)
    # Tiny dots: HIGHEST precision is free and matches an unfused f32 reference.
    W = jnp.dot(w1, w2, precision=hp)                                   # (10, 3)
    bf = jnp.dot(b1.reshape(1, -1), w2, precision=hp) + b2.reshape(1, -1)  # (1, 3)
    wT = W.T.astype(jnp.float32)                                        # (3, 10)
    bT = bf.T.astype(jnp.float32)                                       # (3, 1)

    # Conv2d(1,1,1) on a single channel is a scalar scale + bias.  Accept the
    # PyTorch shapes (1,1,1,1)/(1,) or raw scalars.  Must NOT be folded into W/b
    # because ReLU sits in between.
    cw = jnp.asarray(conv_w, jnp.float32).reshape(())
    cb = jnp.asarray(conv_b, jnp.float32).reshape(())
    cwb = jnp.stack([cw, cb])                                           # (2,) SMEM

    # Native-layout input: pad batch only up to a multiple of 128 (no-op when
    # already aligned), no transpose, no padding to a multiple of tile_b.
    x = x.astype(jnp.float32)
    Bp = _round_up(B, 128)
    if Bp != B:
        x = jnp.pad(x, ((0, Bp - B), (0, 0)))

    tile_b = min(max_tile_b, Bp)            # large tiles; partial last block is OK
    grid_b = pl.cdiv(Bp, tile_b)

    out_T = pl.pallas_call(
        _fused_kernel,
        out_shape=jax.ShapeDtypeStruct((3, Bp), jnp.float32),
        grid=(grid_b,),
        in_specs=[
            pl.BlockSpec((3, 10), lambda i: (0, 0)),              # wT (resident)
            pl.BlockSpec((3, 1), lambda i: (0, 0)),               # bT (resident)
            pl.BlockSpec(memory_space=pltpu.MemorySpace.SMEM),    # conv scalars
            pl.BlockSpec((tile_b, 10), lambda i: (i, 0)),         # x (streamed, native)
        ],
        out_specs=pl.BlockSpec((3, tile_b), lambda i: (0, i)),    # lane-dense stores
        compiler_params=pltpu.CompilerParams(
            dimension_semantics=("parallel",),
            vmem_limit_bytes=48 * 1024 * 1024),   # room for big double-buffers, < v7x 64 MiB
    )(wT, bT, cwb, x)

    # Glue: drop batch padding, back to (B, 3), then PyTorch's view(B, 1, 3, 1).
    # (Kept lane-dense inside the kernel; this small transpose is wrapper-side by
    #  the module's output-shape contract.)
    return out_T[:, :B].T.reshape(B, 1, 3, 1)


if __name__ == "__main__":
    key = jax.random.PRNGKey(0)
    kx, k1, k2, k3, k4, k5, k6 = jax.random.split(key, 7)

    B = 8  # small batch, consistent with the module's 10-feature input
    x = jax.random.normal(kx, (B, 10), jnp.float32)
    # nn.Linear(10, 5): weight stored transposed as (10, 5); bias as (1, 5)
    w1 = jax.random.normal(k1, (10, 5), jnp.float32) * 0.1
    b1 = jax.random.normal(k2, (1, 5), jnp.float32) * 0.1
    # nn.Linear(5, 3)
    w2 = jax.random.normal(k3, (5, 3), jnp.float32) * 0.1
    b2 = jax.random.normal(k4, (1, 3), jnp.float32) * 0.1
    # nn.Conv2d(1, 1, 1): weight (1,1,1,1), bias (1,)  (PyTorch-native shapes)
    conv_w = jax.random.normal(k5, (1, 1, 1, 1), jnp.float32) * 0.1
    conv_b = jax.random.normal(k6, (1,), jnp.float32) * 0.1

    model = jax.jit(complex_model2)   # keep weight-fusion glue inside one jit
    out = jax.block_until_ready(model(x, w1, b1, w2, b2, conv_w, conv_b))

    # Pure-JAX (unfused) reference for correctness, at HIGHEST precision.
    hp = jax.lax.Precision.HIGHEST
    ref = jnp.dot(jnp.dot(x, w1, precision=hp) + b1, w2, precision=hp) + b2
    ref = jnp.maximum(ref, 0.0)
    ref = (ref * conv_w.reshape(()) + conv_b.reshape(())).reshape(B, 1, 3, 1)

    assert out.shape == (B, 1, 3, 1), out.shape
    # Tolerance covers the MXU's internal f32 pass decomposition for the fused dot.
    assert jnp.allclose(out, ref, atol=1e-3, rtol=1e-3), "mismatch vs reference"
    print("KERNEL_OK")
</pallas_src>

<mosaic_0001>
module attributes {stable_mosaic.version = 11 : i64} {
  func.func @_fused_kernel(%arg0: i32, %arg1: memref<3x10xf32, #tpu.memory_space<vmem>>, %arg2: memref<3x1xf32, #tpu.memory_space<vmem>>, %arg3: memref<2xf32, #tpu.memory_space<smem>>, %arg4: memref<128x10xf32, #tpu.memory_space<vmem>>, %arg5: memref<3x128xf32, #tpu.memory_space<vmem>>) attributes {dimension_semantics = [#tpu.dimension_semantics<parallel>], iteration_bounds = array<i64: 1>, scalar_prefetch = 0 : i64, scratch_operands = 0 : i64, tpu.core_type = #tpu.core_type<tc>, window_params = [{pipeline_mode = #tpu.pipeline_mode<synchronous>, transform_indices = @transform_0, window_bounds = array<i64: 3, 10>}, {pipeline_mode = #tpu.pipeline_mode<synchronous>, transform_indices = @transform_1, window_bounds = array<i64: 3, 1>}, {transform_indices = @transform_2, window_bounds = array<i64: 2>}, {transform_indices = @transform_3, window_bounds = array<i64: 128, 10>}, {transform_indices = @transform_4, window_bounds = array<i64: 3, 128>}]} {
    %c0 = arith.constant 0 : index
    %0 = memref.load %arg3[%c0] : memref<2xf32, #tpu.memory_space<smem>>
    %c1 = arith.constant 1 : index
    %1 = memref.load %arg3[%c1] : memref<2xf32, #tpu.memory_space<smem>>
    %c0_0 = arith.constant 0 : index
    %c0_1 = arith.constant 0 : index
    %2 = vector.load %arg1[%c0_0, %c0_1] : memref<3x10xf32, #tpu.memory_space<vmem>>, vector<3x10xf32>
    %c0_2 = arith.constant 0 : index
    %c0_3 = arith.constant 0 : index
    %3 = vector.load %arg4[%c0_2, %c0_3] : memref<128x10xf32, #tpu.memory_space<vmem>>, vector<128x10xf32>
    %cst = arith.constant dense<0.000000e+00> : vector<3x128xf32>
    %4 = tpu.matmul %2, %3, %cst {dimension_numbers = #tpu.dot_dimension_numbers<[1], [1], [0], [0], [0, 0, 1, 0], [], []>} : vector<3x10xf32>, vector<128x10xf32>, vector<3x128xf32> -> vector<3x128xf32>
    %c0_4 = arith.constant 0 : index
    %c0_5 = arith.constant 0 : index
    %5 = vector.load %arg2[%c0_4, %c0_5] : memref<3x1xf32, #tpu.memory_space<vmem>>, vector<3x1xf32>
    %6 = vector.broadcast %5 : vector<3x1xf32> to vector<3x128xf32>
    %7 = arith.addf %4, %6 : vector<3x128xf32>
    %cst_6 = arith.constant 0.000000e+00 : f32
    %8 = vector.broadcast %cst_6 : f32 to vector<3x128xf32>
    %9 = arith.maximumf %7, %8 : vector<3x128xf32>
    %10 = vector.broadcast %0 : f32 to vector<3x128xf32>
    %11 = arith.mulf %9, %10 : vector<3x128xf32>
    %12 = vector.broadcast %1 : f32 to vector<3x128xf32>
    %13 = arith.addf %11, %12 : vector<3x128xf32>
    %c0_7 = arith.constant 0 : index
    %c0_8 = arith.constant 0 : index
    %14 = vector.load %arg5[%c0_7, %c0_8] : memref<3x128xf32, #tpu.memory_space<vmem>>, vector<3x128xf32>
    tpu.vector_store %arg5[%c0_7, %c0_8], %13 {strides = array<i32>} : memref<3x128xf32, #tpu.memory_space<vmem>>, vector<3x128xf32>,
    return
  }
  func.func @transform_0(%arg0: i32) -> (i32, i32) {
    %c0_i32 = arith.constant 0 : i32
    %c0_i32_0 = arith.constant 0 : i32
    %c0_i32_1 = arith.constant 0 : i32
    return %c0_i32, %c0_i32_0 : i32, i32
  }
  func.func @transform_1(%arg0: i32) -> (i32, i32) {
    %c0_i32 = arith.constant 0 : i32
    %c0_i32_0 = arith.constant 0 : i32
    %c0_i32_1 = arith.constant 0 : i32
    return %c0_i32, %c0_i32_0 : i32, i32
  }
  func.func @transform_2(%arg0: i32) -> i32 {
    %c0_i32 = arith.constant 0 : i32
    %c0_i32_0 = arith.constant 0 : i32
    return %c0_i32 : i32
  }
  func.func @transform_3(%arg0: i32) -> (i32, i32) {
    %c0_i32 = arith.constant 0 : i32
    %c0_i32_0 = arith.constant 0 : i32
    return %arg0, %c0_i32 : i32, i32
  }
  func.func @transform_4(%arg0: i32) -> (i32, i32) {
    %c0_i32 = arith.constant 0 : i32
    %c0_i32_0 = arith.constant 0 : i32
    return %c0_i32, %arg0 : i32, i32
  }
}

</mosaic_0001>

<bundles_post_ra>
// kernel: complex_model2.1
= control target key start
LH: loop header
LB: loop body
LE: loop exit
PB: predicated region body
PF: predicated region fallthrough
CT: control target
= control target key end

     0   :  { %9 = vsyncpa [#allocation3], 0  ;;  %s423_s0 = inlined_call_operand.vmem [shape: f32[3,10], index: 0, kind: input, shape index: {}]   ;;  %s424_s1 = inlined_call_operand.vmem [shape: f32[3,1], index: 1, kind: input, shape index: {}]   ;;  %s425_s2 = inlined_call_operand.vmem [shape: f32[2], index: 2, kind: input, shape index: {}]   ;;  %s426_s3 = inlined_call_operand.vmem [shape: f32[128,10], index: 3, kind: input, shape index: {}]   ;;  %s427_s4 = inlined_call_operand.vmem [shape: f32[3,128], index: 4, kind: output, shape index: {}]  }
   0x1   :  { %s20_s17 = sshll.u32 %s425_s2, 4  ;;  %s21_s17 = int_to_ptr.vmem [resolvable:$true] %s20_s17 }
   0x2   :  { %s296_s18 = scalar_lea.vmem %s21_s17, 16  ;;  %p301_p1 = scmp.lt.s32.totalorder %s21_s17, %s21_s17 }
   0x3   :  { %p297_p0 = scmp.ne.s32.totalorder %s21_s17, %s296_s18  ;;  %p302_p2 = scmp.lt.s32.totalorder %s296_s18, %s296_s18 }
   0x5   :  { %p303_p3 = por %p302_p2, %p301_p1 }
   0x7   :  { %p304_p4 = pnand %p303_p3, %p297_p0 }
   0x9   :  { %307 = shalt.err (!%p304_p4)
}
   0xa   :  { %s310_s19 = smov [#allocation2]  }
   0xb   :  { %23 = dma.vmem_to_smem %s21_s17, 16, %s310_s19, [#allocation3]  }
   0xc   :  { %308 = dma.done.wait [#allocation3], 16  }
   0xd   :  { %309 = vsyncadd [#allocation3], 4294967280 }
   0xe   :  { %29 = sfence }
   0xf   :  { %v33_v0 = vld [vmem:[%s426_s3] sm:$0xff]  ;;  %v34_v1 = vld [vmem:[%s426_s3 + $0x8] sm:$0xff]  ;;  %vm55_vm0 = vcmask 80896   ;;  %v311_v2 = vmov 0.0|0.0   ;;  %vm312_vm2 = vmmov 0   ;;  %v313_v5 = vmov 0.0  }
  0x10   :  { %258 = vmatprep.subr.bf16.mxu0 %v311_v2  ;;  %v259_v3 = vpack.c.bf16 %v34_v1, %v33_v0  ;;  %vm351_vm1 = vmpackc.low %vm55_vm0, %vm55_vm0  ;;  %255 = vmatprep.mubr.msk.f32.mxu0 %vm312_vm2, %v313_v5  ;;  %v314_v6 = vmov 0   ;;  %v35_v7 = vld [vmem:[%s426_s3 + $0x10] sm:$0xff]  ;;  %v36_v8 = vld [vmem:[%s426_s3 + $0x18] sm:$0xff]  ;;  %s30_s27 = sld [smem:[#allocation2]]  ;;  %s188_s28 = sld [smem:[#allocation2 + $0x1]] }
  0x11   :  { %295 = vset.pattern.permute.xlu0 %v314_v6  ;;  %v49_v9 = vld [vmem:[%s424_s1] sm:$0x7]  ;;  %v263_v10 = vpack.c.bf16 %v36_v8, %v35_v7  ;;  %v38_v12 = vld [vmem:[%s426_s3 + $0x28] sm:$0xff]  ;;  %v39_v14 = vld [vmem:[%s426_s3 + $0x30] sm:$0xff] }
  0x12   :  { %261 = vmatpush3.bf16.xpose.msk.msra.mxu0 %vm351_vm1, %v259_v3  ;;  %52 = vperm.xlu0 %295, %v49_v9   ;;  %v37_v11 = vld [vmem:[%s426_s3 + $0x20] sm:$0xff]  ;;  %v40_v15 = vld [vmem:[%s426_s3 + $0x38] sm:$0xff]  ;;  %v42_v18 = vld [vmem:[%s426_s3 + $0x48] sm:$0xff] }
  0x13   :  { %262 = vmatprep.subr.bf16.mxu0 %v311_v2  ;;  %v267_v13 = vpack.c.bf16 %v38_v12, %v37_v11  ;;  %v271_v16 = vpack.c.bf16 %v40_v15, %v39_v14  ;;  %v41_v17 = vld [vmem:[%s426_s3 + $0x40] sm:$0xff]  ;;  %v43_v20 = vld [vmem:[%s426_s3 + $0x50] sm:$0xff]  ;;  %v44_v21 = vld [vmem:[%s426_s3 + $0x58] sm:$0xff] }
  0x14   :  { %v275_v19 = vpack.c.bf16 %v42_v18, %v41_v17  ;;  %v279_v22 = vpack.c.bf16 %v44_v21, %v43_v20  ;;  %v45_v23 = vld [vmem:[%s426_s3 + $0x60] sm:$0xff]  ;;  %v46_v24 = vld [vmem:[%s426_s3 + $0x68] sm:$0xff]  ;;  %v47_v26 = vld [vmem:[%s426_s3 + $0x70] sm:$0xff] }
  0x15   :  { %v283_v25 = vpack.c.bf16 %v46_v24, %v45_v23  ;;  %v48_v27 = vld [vmem:[%s426_s3 + $0x78] sm:$0xff]  ;;  %v32_v29 = vld [vmem:[%s423_s0] sm:$0x7] }
  0x16   :  { %v287_v28 = vpack.c.bf16 %v48_v27, %v47_v26  ;;  %v178_v34 = vstv %s30_s27  ;;  %v180_v36 = vstv %s188_s28 }
  0x1a   :  { %265 = vmatpush3.bf16.xpose.msk.msra.mxu0 %vm351_vm1, %v263_v10 }
  0x1b   :  { %266 = vmatprep.subr.bf16.mxu0 %v311_v2 }
  0x22   :  { %269 = vmatpush3.bf16.xpose.msk.msra.mxu0 %vm351_vm1, %v267_v13 }
  0x23   :  { %270 = vmatprep.subr.bf16.mxu0 %v311_v2 }
  0x2a   :  { %273 = vmatpush3.bf16.xpose.msk.msra.mxu0 %vm351_vm1, %v271_v16 }
  0x2b   :  { %274 = vmatprep.subr.bf16.mxu0 %v311_v2 }
  0x32   :  { %277 = vmatpush3.bf16.xpose.msk.msra.mxu0 %vm351_vm1, %v275_v19 }
  0x33   :  { %278 = vmatprep.subr.bf16.mxu0 %v311_v2 }
  0x3a   :  { %281 = vmatpush3.bf16.xpose.msk.msra.mxu0 %vm351_vm1, %v279_v22 }
  0x3b   :  { %282 = vmatprep.subr.bf16.mxu0 %v311_v2 }
  0x42   :  { %285 = vmatpush3.bf16.xpose.msk.msra.mxu0 %vm351_vm1, %v283_v25 }
  0x43   :  { %286 = vmatprep.subr.bf16.mxu0 %v311_v2 }
  0x4a   :  { %289 = vmatpush3.bf16.xpose.msk.msra.mxu0 %vm351_vm1, %v287_v28 }
  0x51   :  { %256 = vmatmul.mubr.msk.f32.vlgmr.msra.gmra.mrb[0].mxu0 %vm55_vm0, %v32_v29 }
  0x91   :  { %v53_v30 = vpop.permute.xlu0 %52 }
 0x124   :  { %v173_v31 = vpop.f32.mrb[0].mxu0 }
 0x125   :  { %v174_v32 = vadd.f32 %v173_v31, %v53_v30  ;;  %v257_v33 = vpop.f32.mrb[1].mxu0 }
 0x127   :  { %v177_v35 = vmax.f32 %v174_v32, 0.0 }
 0x129   :  { %v179_v37 = vmul.f32 %v178_v34, %v177_v35 }
 0x12b   :  { %v181_v38 = vadd.f32 %v180_v36, %v179_v37 }
 0x12d   :  { %182 = vst [vmem:[%s427_s4] sm:$0x7] %v181_v38 }
 0x12e   :  { %187 = vsyncpa [#allocation3], 1 }

</bundles_post_ra>
